<compile_context>
chip_gen: v5e
topology: v5e:2x2
jax: 0.10.0
libtpu: 0.0.40
codegen_flags: <defaults>
</compile_context>

<pallas_src>
import jax
import jax.numpy as jnp
from jax.experimental import pallas as pl
from jax.experimental.pallas import tpu as pltpu


def _round_up(x, m):
    return ((x + m - 1) // m) * m


# VMEM budget for the double-buffered input pipeline:
#   2 arrays * 2 buffers * C * TN * itemsize  <=  _PIPELINE_VMEM_BUDGET
# Kept well under the scoped-VMEM defaults (16 MiB v5e / 32 MiB v6e,v7x)
# and far under v7x's 64 MiB physical VMEM.
_PIPELINE_VMEM_BUDGET = 8 * 1024 * 1024


def _choose_tn(C, HW, itemsize):
    cap = _PIPELINE_VMEM_BUDGET // (4 * C * itemsize)
    cap = max(128, (cap // 128) * 128)
    return int(min(_round_up(HW, 128), cap))


# ---------------------------------------------------------------------------
# Fused kernel: per-(batch, channel) raw moments of true/pred in one pass.
# ---------------------------------------------------------------------------
def _make_moments_kernel(C, TN, HW):
    needs_mask = (HW % TN) != 0  # static: tail tile (or HW < 128) needs masking

    def kernel(t_ref, p_ref, st_ref, sp_ref, stt_ref, spp_ref, stp_ref):
        j = pl.program_id(1)

        @pl.when(j == 0)
        def _():
            st_ref[...] = jnp.zeros_like(st_ref)
            sp_ref[...] = jnp.zeros_like(sp_ref)
            stt_ref[...] = jnp.zeros_like(stt_ref)
            spp_ref[...] = jnp.zeros_like(spp_ref)
            stp_ref[...] = jnp.zeros_like(stp_ref)

        t = t_ref[...].astype(jnp.float32)   # (C, TN)  in-kernel upcast
        p = p_ref[...].astype(jnp.float32)

        if needs_mask:
            lane = jax.lax.broadcasted_iota(jnp.int32, (C, TN), 1) + j * TN
            valid = lane < HW
            zero = jnp.zeros_like(t)
            t = jnp.where(valid, t, zero)
            p = jnp.where(valid, p, zero)

        st_ref[...] += jnp.sum(t, axis=1, keepdims=True)
        sp_ref[...] += jnp.sum(p, axis=1, keepdims=True)
        stt_ref[...] += jnp.sum(t * t, axis=1, keepdims=True)
        spp_ref[...] += jnp.sum(p * p, axis=1, keepdims=True)
        stp_ref[...] += jnp.sum(t * p, axis=1, keepdims=True)

    return kernel


def _acc_moments(t_bchw, p_bchw):
    """t/p: (B, C, HW) native dtype -> five (B, C, 1) f32 per-batch partial sums."""
    B, C, HW = t_bchw.shape
    itemsize = jnp.dtype(t_bchw.dtype).itemsize
    TN = _choose_tn(C, HW, itemsize)
    nj = (HW + TN - 1) // TN

    tile_spec = pl.BlockSpec((None, C, TN), lambda b, j: (b, 0, j))
    acc_spec = pl.BlockSpec((None, C, 1), lambda b, j: (b, 0, 0))
    out_sd = jax.ShapeDtypeStruct((B, C, 1), jnp.float32)

    return pl.pallas_call(
        _make_moments_kernel(C, TN, HW),
        out_shape=(out_sd,) * 5,
        grid_spec=pltpu.PrefetchScalarGridSpec(
            num_scalar_prefetch=0,
            grid=(B, nj),
            in_specs=[tile_spec, tile_spec],
            out_specs=[acc_spec] * 5,
        ),
        compiler_params=pltpu.CompilerParams(
            dimension_semantics=("parallel", "arbitrary"),
            vmem_limit_bytes=32 * 1024 * 1024,
        ),
    )(t_bchw, p_bchw)


# ---------------------------------------------------------------------------
# Module wrapper (equivalent of ACCLoss.forward)
# ---------------------------------------------------------------------------
@jax.jit
def acc_loss(true_nchw, pred_nchw):
    B, C, H, W = true_nchw.shape
    HW = H * W
    t = true_nchw.reshape(B, C, HW)   # contiguous reshape; no transpose copy
    p = pred_nchw.reshape(B, C, HW)

    st, sp, stt, spp, stp = _acc_moments(t, p)

    n = jnp.float32(B * HW)
    s_t = jnp.sum(st[:, :, 0], axis=0)    # (C,) combine per-batch partials
    s_p = jnp.sum(sp[:, :, 0], axis=0)
    s_tt = jnp.sum(stt[:, :, 0], axis=0)
    s_pp = jnp.sum(spp[:, :, 0], axis=0)
    s_tp = jnp.sum(stp[:, :, 0], axis=0)

    # TODO(synk): raw-moment variances can lose precision when |mean| >> std;
    # switch to a two-pass centered accumulation if that regime matters.
    m = s_t / n                              # per-channel TrueMean
    e_p = s_p / n
    cov = s_tp / n - m * e_p                 # E[(p - m)(t - m)]   (E[t] == m)
    tvar = s_tt / n - m * m                  # E[(t - m)^2]
    pvar = s_pp / n - 2.0 * m * e_p + m * m  # E[(p - m)^2]
    std = jnp.sqrt(pvar * tvar)
    return -jnp.mean(cov / std)


# Pure-JAX reference (mirrors the PyTorch ACCLoss) for a sanity check.
def acc_loss_ref(true, pred):
    true = true.astype(jnp.float32)
    pred = pred.astype(jnp.float32)
    true_mean = jnp.mean(true, axis=(0, 2, 3), keepdims=True)
    ta = true - true_mean
    pa = pred - true_mean
    cov = jnp.mean(pa * ta, axis=(0, 2, 3))
    std = jnp.sqrt(jnp.mean(pa ** 2, axis=(0, 2, 3)) * jnp.mean(ta ** 2, axis=(0, 2, 3)))
    return -jnp.mean(cov / std)


if __name__ == "__main__":
    test_cases = [
        ((2, 5, 16, 16), jnp.float32, 1e-4, 1e-5),    # HW multiple of 128
        ((2, 5, 10, 10), jnp.float32, 1e-4, 1e-5),    # HW=100: tail-mask path
        ((2, 5, 16, 16), jnp.bfloat16, 5e-3, 1e-3),   # native low-precision input
    ]
    key = jax.random.PRNGKey(0)
    for shape, dtype, rtol, atol in test_cases:
        k1, k2 = jax.random.split(key)
        true = jax.random.normal(k1, shape, dtype=jnp.float32)
        pred = true + 0.1 * jax.random.normal(k2, shape, dtype=jnp.float32)
        true = true.astype(dtype)
        pred = pred.astype(dtype)

        out = jax.block_until_ready(acc_loss(true, pred))
        ref = acc_loss_ref(true, pred)
        assert jnp.allclose(out, ref, rtol=rtol, atol=atol), (shape, dtype, out, ref)

    print("KERNEL_OK")
</pallas_src>

<mosaic_0001>
module attributes {stable_mosaic.version = 11 : i64} {
  func.func @kernel(%arg0: i32, %arg1: i32, %arg2: memref<1x5x256xf32, #tpu.memory_space<vmem>>, %arg3: memref<1x5x256xf32, #tpu.memory_space<vmem>>, %arg4: memref<1x5x1xf32, #tpu.memory_space<vmem>>, %arg5: memref<1x5x1xf32, #tpu.memory_space<vmem>>, %arg6: memref<1x5x1xf32, #tpu.memory_space<vmem>>, %arg7: memref<1x5x1xf32, #tpu.memory_space<vmem>>, %arg8: memref<1x5x1xf32, #tpu.memory_space<vmem>>) attributes {dimension_semantics = [#tpu.dimension_semantics<parallel>, #tpu.dimension_semantics<arbitrary>], iteration_bounds = array<i64: 2, 1>, scalar_prefetch = 0 : i64, scratch_operands = 0 : i64, tpu.core_type = #tpu.core_type<tc>, window_params = [{transform_indices = @transform_0, window_bounds = array<i64: 1, 5, 256>}, {transform_indices = @transform_1, window_bounds = array<i64: 1, 5, 256>}, {transform_indices = @transform_2, window_bounds = array<i64: 1, 5, 1>}, {transform_indices = @transform_3, window_bounds = array<i64: 1, 5, 1>}, {transform_indices = @transform_4, window_bounds = array<i64: 1, 5, 1>}, {transform_indices = @transform_5, window_bounds = array<i64: 1, 5, 1>}, {transform_indices = @transform_6, window_bounds = array<i64: 1, 5, 1>}]} {
    %c0_i32 = arith.constant 0 : i32
    %0 = arith.cmpi eq, %arg1, %c0_i32 : i32
    %1 = arith.extui %0 : i1 to i32
    %c0_i32_0 = arith.constant 0 : i32
    %2 = arith.cmpi ne, %1, %c0_i32_0 : i32
    scf.if %2 {
      %cst_40 = arith.constant 0.000000e+00 : f32
      %50 = vector.broadcast %cst_40 : f32 to vector<5x1xf32>
      %c0_41 = arith.constant 0 : index
      %c0_42 = arith.constant 0 : index
      %c0_43 = arith.constant 0 : index
      %51 = vector.load %arg4[%c0_41, %c0_42, %c0_43] : memref<1x5x1xf32, #tpu.memory_space<vmem>>, vector<1x5x1xf32>
      %52 = vector.shape_cast %51 : vector<1x5x1xf32> to vector<5x1xf32>
      %53 = vector.shape_cast %50 : vector<5x1xf32> to vector<1x5x1xf32>
      tpu.vector_store %arg4[%c0_41, %c0_42, %c0_43], %53 {strides = array<i32>} : memref<1x5x1xf32, #tpu.memory_space<vmem>>, vector<1x5x1xf32>,
      %cst_44 = arith.constant 0.000000e+00 : f32
      %54 = vector.broadcast %cst_44 : f32 to vector<5x1xf32>
      %c0_45 = arith.constant 0 : index
      %c0_46 = arith.constant 0 : index
      %c0_47 = arith.constant 0 : index
      %55 = vector.load %arg5[%c0_45, %c0_46, %c0_47] : memref<1x5x1xf32, #tpu.memory_space<vmem>>, vector<1x5x1xf32>
      %56 = vector.shape_cast %55 : vector<1x5x1xf32> to vector<5x1xf32>
      %57 = vector.shape_cast %54 : vector<5x1xf32> to vector<1x5x1xf32>
      tpu.vector_store %arg5[%c0_45, %c0_46, %c0_47], %57 {strides = array<i32>} : memref<1x5x1xf32, #tpu.memory_space<vmem>>, vector<1x5x1xf32>,
      %cst_48 = arith.constant 0.000000e+00 : f32
      %58 = vector.broadcast %cst_48 : f32 to vector<5x1xf32>
      %c0_49 = arith.constant 0 : index
      %c0_50 = arith.constant 0 : index
      %c0_51 = arith.constant 0 : index
      %59 = vector.load %arg6[%c0_49, %c0_50, %c0_51] : memref<1x5x1xf32, #tpu.memory_space<vmem>>, vector<1x5x1xf32>
      %60 = vector.shape_cast %59 : vector<1x5x1xf32> to vector<5x1xf32>
      %61 = vector.shape_cast %58 : vector<5x1xf32> to vector<1x5x1xf32>
      tpu.vector_store %arg6[%c0_49, %c0_50, %c0_51], %61 {strides = array<i32>} : memref<1x5x1xf32, #tpu.memory_space<vmem>>, vector<1x5x1xf32>,
      %cst_52 = arith.constant 0.000000e+00 : f32
      %62 = vector.broadcast %cst_52 : f32 to vector<5x1xf32>
      %c0_53 = arith.constant 0 : index
      %c0_54 = arith.constant 0 : index
      %c0_55 = arith.constant 0 : index
      %63 = vector.load %arg7[%c0_53, %c0_54, %c0_55] : memref<1x5x1xf32, #tpu.memory_space<vmem>>, vector<1x5x1xf32>
      %64 = vector.shape_cast %63 : vector<1x5x1xf32> to vector<5x1xf32>
      %65 = vector.shape_cast %62 : vector<5x1xf32> to vector<1x5x1xf32>
      tpu.vector_store %arg7[%c0_53, %c0_54, %c0_55], %65 {strides = array<i32>} : memref<1x5x1xf32, #tpu.memory_space<vmem>>, vector<1x5x1xf32>,
      %cst_56 = arith.constant 0.000000e+00 : f32
      %66 = vector.broadcast %cst_56 : f32 to vector<5x1xf32>
      %c0_57 = arith.constant 0 : index
      %c0_58 = arith.constant 0 : index
      %c0_59 = arith.constant 0 : index
      %67 = vector.load %arg8[%c0_57, %c0_58, %c0_59] : memref<1x5x1xf32, #tpu.memory_space<vmem>>, vector<1x5x1xf32>
      %68 = vector.shape_cast %67 : vector<1x5x1xf32> to vector<5x1xf32>
      %69 = vector.shape_cast %66 : vector<5x1xf32> to vector<1x5x1xf32>
      tpu.vector_store %arg8[%c0_57, %c0_58, %c0_59], %69 {strides = array<i32>} : memref<1x5x1xf32, #tpu.memory_space<vmem>>, vector<1x5x1xf32>,
    } else {
    }
    %c0 = arith.constant 0 : index
    %c0_1 = arith.constant 0 : index
    %c0_2 = arith.constant 0 : index
    %3 = vector.load %arg2[%c0, %c0_1, %c0_2] : memref<1x5x256xf32, #tpu.memory_space<vmem>>, vector<1x5x256xf32>
    %4 = vector.shape_cast %3 : vector<1x5x256xf32> to vector<5x256xf32>
    %c0_3 = arith.constant 0 : index
    %c0_4 = arith.constant 0 : index
    %c0_5 = arith.constant 0 : index
    %5 = vector.load %arg3[%c0_3, %c0_4, %c0_5] : memref<1x5x256xf32, #tpu.memory_space<vmem>>, vector<1x5x256xf32>
    %6 = vector.shape_cast %5 : vector<1x5x256xf32> to vector<5x256xf32>
    %c0_6 = arith.constant 0 : index
    %c0_7 = arith.constant 0 : index
    %c0_8 = arith.constant 0 : index
    %7 = vector.load %arg4[%c0_6, %c0_7, %c0_8] : memref<1x5x1xf32, #tpu.memory_space<vmem>>, vector<1x5x1xf32>
    %8 = vector.shape_cast %7 : vector<1x5x1xf32> to vector<5x1xf32>
    %cst = arith.constant dense<0.000000e+00> : vector<5xf32>
    %9 = vector.multi_reduction <add>, %4, %cst [1] : vector<5x256xf32> to vector<5xf32>
    %10 = vector.shape_cast %9 : vector<5xf32> to vector<5x1xf32>
    %11 = arith.addf %8, %10 : vector<5x1xf32>
    %c0_9 = arith.constant 0 : index
    %c0_10 = arith.constant 0 : index
    %c0_11 = arith.constant 0 : index
    %12 = vector.load %arg4[%c0_9, %c0_10, %c0_11] : memref<1x5x1xf32, #tpu.memory_space<vmem>>, vector<1x5x1xf32>
    %13 = vector.shape_cast %12 : vector<1x5x1xf32> to vector<5x1xf32>
    %14 = vector.shape_cast %11 : vector<5x1xf32> to vector<1x5x1xf32>
    tpu.vector_store %arg4[%c0_9, %c0_10, %c0_11], %14 {strides = array<i32>} : memref<1x5x1xf32, #tpu.memory_space<vmem>>, vector<1x5x1xf32>,
    %c0_12 = arith.constant 0 : index
    %c0_13 = arith.constant 0 : index
    %c0_14 = arith.constant 0 : index
    %15 = vector.load %arg5[%c0_12, %c0_13, %c0_14] : memref<1x5x1xf32, #tpu.memory_space<vmem>>, vector<1x5x1xf32>
    %16 = vector.shape_cast %15 : vector<1x5x1xf32> to vector<5x1xf32>
    %cst_15 = arith.constant dense<0.000000e+00> : vector<5xf32>
    %17 = vector.multi_reduction <add>, %6, %cst_15 [1] : vector<5x256xf32> to vector<5xf32>
    %18 = vector.shape_cast %17 : vector<5xf32> to vector<5x1xf32>
    %19 = arith.addf %16, %18 : vector<5x1xf32>
    %c0_16 = arith.constant 0 : index
    %c0_17 = arith.constant 0 : index
    %c0_18 = arith.constant 0 : index
    %20 = vector.load %arg5[%c0_16, %c0_17, %c0_18] : memref<1x5x1xf32, #tpu.memory_space<vmem>>, vector<1x5x1xf32>
    %21 = vector.shape_cast %20 : vector<1x5x1xf32> to vector<5x1xf32>
    %22 = vector.shape_cast %19 : vector<5x1xf32> to vector<1x5x1xf32>
    tpu.vector_store %arg5[%c0_16, %c0_17, %c0_18], %22 {strides = array<i32>} : memref<1x5x1xf32, #tpu.memory_space<vmem>>, vector<1x5x1xf32>,
    %c0_19 = arith.constant 0 : index
    %c0_20 = arith.constant 0 : index
    %c0_21 = arith.constant 0 : index
    %23 = vector.load %arg6[%c0_19, %c0_20, %c0_21] : memref<1x5x1xf32, #tpu.memory_space<vmem>>, vector<1x5x1xf32>
    %24 = vector.shape_cast %23 : vector<1x5x1xf32> to vector<5x1xf32>
    %25 = arith.mulf %4, %4 : vector<5x256xf32>
    %cst_22 = arith.constant dense<0.000000e+00> : vector<5xf32>
    %26 = vector.multi_reduction <add>, %25, %cst_22 [1] : vector<5x256xf32> to vector<5xf32>
    %27 = vector.shape_cast %26 : vector<5xf32> to vector<5x1xf32>
    %28 = arith.addf %24, %27 : vector<5x1xf32>
    %c0_23 = arith.constant 0 : index
    %c0_24 = arith.constant 0 : index
    %c0_25 = arith.constant 0 : index
    %29 = vector.load %arg6[%c0_23, %c0_24, %c0_25] : memref<1x5x1xf32, #tpu.memory_space<vmem>>, vector<1x5x1xf32>
    %30 = vector.shape_cast %29 : vector<1x5x1xf32> to vector<5x1xf32>
    %31 = vector.shape_cast %28 : vector<5x1xf32> to vector<1x5x1xf32>
    tpu.vector_store %arg6[%c0_23, %c0_24, %c0_25], %31 {strides = array<i32>} : memref<1x5x1xf32, #tpu.memory_space<vmem>>, vector<1x5x1xf32>,
    %c0_26 = arith.constant 0 : index
    %c0_27 = arith.constant 0 : index
    %c0_28 = arith.constant 0 : index
    %32 = vector.load %arg7[%c0_26, %c0_27, %c0_28] : memref<1x5x1xf32, #tpu.memory_space<vmem>>, vector<1x5x1xf32>
    %33 = vector.shape_cast %32 : vector<1x5x1xf32> to vector<5x1xf32>
    %34 = arith.mulf %6, %6 : vector<5x256xf32>
    %cst_29 = arith.constant dense<0.000000e+00> : vector<5xf32>
    %35 = vector.multi_reduction <add>, %34, %cst_29 [1] : vector<5x256xf32> to vector<5xf32>
    %36 = vector.shape_cast %35 : vector<5xf32> to vector<5x1xf32>
    %37 = arith.addf %33, %36 : vector<5x1xf32>
    %c0_30 = arith.constant 0 : index
    %c0_31 = arith.constant 0 : index
    %c0_32 = arith.constant 0 : index
    %38 = vector.load %arg7[%c0_30, %c0_31, %c0_32] : memref<1x5x1xf32, #tpu.memory_space<vmem>>, vector<1x5x1xf32>
    %39 = vector.shape_cast %38 : vector<1x5x1xf32> to vector<5x1xf32>
    %40 = vector.shape_cast %37 : vector<5x1xf32> to vector<1x5x1xf32>
    tpu.vector_store %arg7[%c0_30, %c0_31, %c0_32], %40 {strides = array<i32>} : memref<1x5x1xf32, #tpu.memory_space<vmem>>, vector<1x5x1xf32>,
    %c0_33 = arith.constant 0 : index
    %c0_34 = arith.constant 0 : index
    %c0_35 = arith.constant 0 : index
    %41 = vector.load %arg8[%c0_33, %c0_34, %c0_35] : memref<1x5x1xf32, #tpu.memory_space<vmem>>, vector<1x5x1xf32>
    %42 = vector.shape_cast %41 : vector<1x5x1xf32> to vector<5x1xf32>
    %43 = arith.mulf %4, %6 : vector<5x256xf32>
    %cst_36 = arith.constant dense<0.000000e+00> : vector<5xf32>
    %44 = vector.multi_reduction <add>, %43, %cst_36 [1] : vector<5x256xf32> to vector<5xf32>
    %45 = vector.shape_cast %44 : vector<5xf32> to vector<5x1xf32>
    %46 = arith.addf %42, %45 : vector<5x1xf32>
    %c0_37 = arith.constant 0 : index
    %c0_38 = arith.constant 0 : index
    %c0_39 = arith.constant 0 : index
    %47 = vector.load %arg8[%c0_37, %c0_38, %c0_39] : memref<1x5x1xf32, #tpu.memory_space<vmem>>, vector<1x5x1xf32>
    %48 = vector.shape_cast %47 : vector<1x5x1xf32> to vector<5x1xf32>
    %49 = vector.shape_cast %46 : vector<5x1xf32> to vector<1x5x1xf32>
    tpu.vector_store %arg8[%c0_37, %c0_38, %c0_39], %49 {strides = array<i32>} : memref<1x5x1xf32, #tpu.memory_space<vmem>>, vector<1x5x1xf32>,
    return
  }
  func.func @transform_0(%arg0: i32, %arg1: i32) -> (i32, i32, i32) {
    %c0_i32 = arith.constant 0 : i32
    %c0_i32_0 = arith.constant 0 : i32
    return %arg0, %c0_i32, %arg1 : i32, i32, i32
  }
  func.func @transform_1(%arg0: i32, %arg1: i32) -> (i32, i32, i32) {
    %c0_i32 = arith.constant 0 : i32
    %c0_i32_0 = arith.constant 0 : i32
    return %arg0, %c0_i32, %arg1 : i32, i32, i32
  }
  func.func @transform_2(%arg0: i32, %arg1: i32) -> (i32, i32, i32) {
    %c0_i32 = arith.constant 0 : i32
    %c0_i32_0 = arith.constant 0 : i32
    %c0_i32_1 = arith.constant 0 : i32
    return %arg0, %c0_i32, %c0_i32_0 : i32, i32, i32
  }
  func.func @transform_3(%arg0: i32, %arg1: i32) -> (i32, i32, i32) {
    %c0_i32 = arith.constant 0 : i32
    %c0_i32_0 = arith.constant 0 : i32
    %c0_i32_1 = arith.constant 0 : i32
    return %arg0, %c0_i32, %c0_i32_0 : i32, i32, i32
  }
  func.func @transform_4(%arg0: i32, %arg1: i32) -> (i32, i32, i32) {
    %c0_i32 = arith.constant 0 : i32
    %c0_i32_0 = arith.constant 0 : i32
    %c0_i32_1 = arith.constant 0 : i32
    return %arg0, %c0_i32, %c0_i32_0 : i32, i32, i32
  }
  func.func @transform_5(%arg0: i32, %arg1: i32) -> (i32, i32, i32) {
    %c0_i32 = arith.constant 0 : i32
    %c0_i32_0 = arith.constant 0 : i32
    %c0_i32_1 = arith.constant 0 : i32
    return %arg0, %c0_i32, %c0_i32_0 : i32, i32, i32
  }
  func.func @transform_6(%arg0: i32, %arg1: i32) -> (i32, i32, i32) {
    %c0_i32 = arith.constant 0 : i32
    %c0_i32_0 = arith.constant 0 : i32
    %c0_i32_1 = arith.constant 0 : i32
    return %arg0, %c0_i32, %c0_i32_0 : i32, i32, i32
  }
}

</mosaic_0001>

<bundles_post_ra>
// kernel: acc_loss.1
= control target key start
LH: loop header
LB: loop body
LE: loop exit
PB: predicated region body
PF: predicated region fallthrough
CT: control target
= control target key end

     0   :  { %s729_s21 = smov 0   ;;  %s731_s22 = smov 0   ;;  %s822_s0 = inlined_call_operand.vmem [shape: f32[2,5,256], index: 0, kind: input, shape index: {}]   ;;  %s823_s1 = inlined_call_operand.vmem [shape: f32[2,5,256], index: 1, kind: input, shape index: {}]   ;;  %s824_s2 = inlined_call_operand.vmem [shape: f32[2,5,1], index: 2, kind: output, shape index: {0}]   ;;  %s825_s3 = inlined_call_operand.vmem [shape: f32[2,5,1], index: 3, kind: output, shape index: {1}]   ;;  %s826_s4 = inlined_call_operand.vmem [shape: f32[2,5,1], index: 4, kind: output, shape index: {2}]   ;;  %s827_s5 = inlined_call_operand.vmem [shape: f32[2,5,1], index: 5, kind: output, shape index: {3}]   ;;  %s828_s6 = inlined_call_operand.vmem [shape: f32[2,5,1], index: 6, kind: output, shape index: {4}]  }
   0x1   :  { %s733_s23 = smov 0  }
   0x2 LB: > { %s29_s24 = sadd.s32 1, %s687_s22  ;;  %p630_p0 = scmp.ge.s32.totalorder %s691_s23, 1  ;;  %s691_s23 = sphi %s733_s23, %s17_s23   ;;  %s687_s22 = sphi %s731_s22, %s830_s22   ;;  %s683_s21 = sphi %s729_s21, %s829_s21  }
   0x3   : > { %p31_p1 = scmp.ge.s32.totalorder %s29_s24, 2  ;;  %p257_p2 = scmp.lt.s32.totalorder %s691_s23, 3 }
   0x5   : > { %s832_s24 = smov (%p31_p1, %s29_s24), 0  ;;  %p258_p3 = pnand %p630_p0, %p257_p2 }
   0x6   : > { %p316_p4 = scmp.lt.s32.totalorder (!%p258_p3), %s683_s21, 1 }
   0x7   : > { %261 = sbr.rel (%p258_p3) target bundleno = 148 (0x94), region = 28 }
   0xc   : > { %s834_s21 = smov (!%p316_p4, %s683_s21), 1  ;;  %vm370_vm0 = vcmask 1044480   ;;  %vm359_vm1 = vcmask 4096   ;;  %v693_v8 = vmov 0.0  }
   0xd   : > { %s642_s25 = sshll.u32 %s834_s21, 4  ;;  %s635_s26 = sshll.u32 %s834_s21, 3 }
   0xe   : > { %s323_s29 = scalar_lea.vmem %s822_s0, %s642_s25  ;;  %s333_s8 = scalar_lea.vmem %s823_s1, %s642_s25 }
   0xf   : > { %v365_v0 = vld [vmem:[%s323_s29] sm:$0x1f]  ;;  %v366_v1 = vld [vmem:[%s323_s29 + $0x8] sm:$0x1f]  ;;  %s756_s11 = scalar_lea.vmem %s826_s4, %s635_s26  ;;  %s761_s14 = scalar_lea.vmem %s824_s2, %s635_s26 }
  0x10   : > { %v367_v2 = vld [vmem:[%s333_s8] sm:$0x1f]  ;;  %v388_v3 = vmul.f32 %v365_v0, %v365_v0  ;;  %v389_v4 = vmul.f32 %v366_v1, %v366_v1  ;;  %v371_v5 = vsel %vm370_vm0, %v365_v0, 0.0  ;;  %v372_v6 = vsel %vm370_vm0, %v366_v1, 0.0  ;;  %v368_v7 = vld [vmem:[%s333_s8 + $0x8] sm:$0x1f]  ;;  %s770_s17 = scalar_lea.vmem %s828_s6, %s635_s26  ;;  %s775_s20 = scalar_lea.vmem %s827_s5, %s635_s26 }
  0x11   : > { %362 = vst.msk [vmem:[%s756_s11] sm:$0x1f] %vm359_vm1, %v693_v8  ;;  %v373_v9 = vadd.f32 %v372_v6, %v371_v5  ;;  %v408_v10 = vmul.f32 %v367_v2, %v365_v0  ;;  %v409_v11 = vmul.f32 %v368_v7, %v366_v1  ;;  %s782_s27 = scalar_lea.vmem %s825_s3, %s635_s26  ;;  %v398_v14 = vmul.f32 %v367_v2, %v367_v2 }
  0x12   : > { %360 = vst.msk [vmem:[%s761_s14] sm:$0x1f] %vm359_vm1, %v693_v8  ;;  %v390_v12 = vsel %vm370_vm0, %v388_v3, 0.0  ;;  %v391_v13 = vsel %vm370_vm0, %v389_v4, 0.0  ;;  %v399_v15 = vmul.f32 %v368_v7, %v368_v7  ;;  %v380_v20 = vsel %vm370_vm0, %v367_v2, 0.0 }
  0x13   : > { %364 = vst.msk [vmem:[%s770_s17] sm:$0x1f] %vm359_vm1, %v693_v8  ;;  %v392_v16 = vadd.f32 %v391_v13, %v390_v12  ;;  %374 = vadd.xlane.f32.xlu0 %v373_v9  ;;  %v410_v17 = vsel %vm370_vm0, %v408_v10, 0.0  ;;  %v411_v18 = vsel %vm370_vm0, %v409_v11, 0.0  ;;  %v381_v21 = vsel %vm370_vm0, %v368_v7, 0.0 }
  0x14   : > { %363 = vst.msk [vmem:[%s775_s20] sm:$0x1f] %vm359_vm1, %v693_v8  ;;  %v412_v19 = vadd.f32 %v411_v18, %v410_v17  ;;  %v400_v22 = vsel %vm370_vm0, %v398_v14, 0.0  ;;  %v401_v23 = vsel %vm370_vm0, %v399_v15, 0.0  ;;  %v382_v24 = vadd.f32 %v381_v21, %v380_v20 }
  0x15   : > { %361 = vst.msk [vmem:[%s782_s27] sm:$0x1f] %vm359_vm1, %v693_v8  ;;  %393 = vadd.xlane.f32.xlu1 %v392_v16  ;;  %v402_v25 = vadd.f32 %v401_v23, %v400_v22 }
  0x16   : > { %413 = vadd.xlane.f32.xlu2 %v412_v19 }
  0x18   : > { %v387_v27 = vld [vmem:[%s756_s11] sm:$0x1f] }
  0x19   : > { %v369_v26 = vld [vmem:[%s761_s14] sm:$0x1f] }
  0x1a   : > { %v407_v30 = vld [vmem:[%s770_s17] sm:$0x1f] }
  0x1b   : > { %383 = vadd.xlane.f32.xlu0 %v382_v24  ;;  %v397_v36 = vld [vmem:[%s775_s20] sm:$0x1f] }
  0x1c   : > { %v379_v35 = vld [vmem:[%s782_s27] sm:$0x1f] }
  0x1d   : > { %403 = vadd.xlane.f32.xlu1 %v402_v25 }
  0x86   : > { %v375_v28 = vpop.xlane.xlu0 %374 }
  0x87   : > { %v376_v29 = vadd.f32 %v375_v28, %v369_v26 }
  0x88   : > { %v394_v31 = vpop.xlane.xlu1 %393 }
  0x89   : > { %v395_v32 = vadd.f32 %v394_v31, %v387_v27  ;;  %378 = vst.msk [vmem:[%s761_s14] sm:$0x1f] %vm359_vm1, %v376_v29  ;;  %v414_v33 = vpop.xlane.xlu2 %413 }
  0x8a   : > { %v415_v34 = vadd.f32 %v414_v33, %v407_v30 }
  0x8b   : > { %396 = vst.msk [vmem:[%s756_s11] sm:$0x1f] %vm359_vm1, %v395_v32 }
  0x8c   : > { %416 = vst.msk [vmem:[%s770_s17] sm:$0x1f] %vm359_vm1, %v415_v34 }
  0x8e   : > { %v384_v37 = vpop.xlane.xlu0 %383 }
  0x8f   : > { %v385_v38 = vadd.f32 %v384_v37, %v379_v35 }
  0x90   : > { %v404_v39 = vpop.xlane.xlu1 %403 }
  0x91   : > { %v405_v40 = vadd.f32 %v404_v39, %v397_v36  ;;  %386 = vst.msk [vmem:[%s782_s27] sm:$0x1f] %vm359_vm1, %v385_v38 }
  0x93   : > { %406 = vst.msk [vmem:[%s775_s20] sm:$0x1f] %vm359_vm1, %v405_v40 }
  0x94 PF: > { %s17_s23 = sadd.s32 1, %s691_s23   ;;  %s829_s21 = smov %s687_s22 }
  0x95   : > { %p14_p5 = scmp.ge.s32.totalorder %s17_s23, 4   ;;  %s830_s22 = smov %s832_s24 }
  0x97   :  { %16 = sbr.rel (!%p14_p5) target bundleno = 2 (0x2), region = 113 }

</bundles_post_ra>
